<compile_context>
chip_gen: v6e
topology: v6e:2x2x1
jax: 0.10.0
libtpu: 0.0.40
codegen_flags: <defaults>
</compile_context>

<pallas_src>
import functools

import numpy as np
import jax
import jax.numpy as jnp
from jax.experimental import pallas as pl
from jax.experimental.pallas import tpu as pltpu

N_PARAMS = 13
LIVE_ROWS = (3, 10, 11, 12)          # roughness, red, green, blue
_LANE = 128


# --------------------------------------------------------------------------
# Tile / VMEM planning (generation-aware, padded-sublane accounting)
# --------------------------------------------------------------------------
def _pad8(n):
    return ((n + 7) // 8) * 8 if n else 0


def _round_up_lane(x):
    return ((x + _LANE - 1) // _LANE) * _LANE


def _vmem_plan():
    """(double_buffered_budget_bytes, vmem_limit_bytes) for the current chip."""
    vmem_cap = 64 * 1024 * 1024                      # conservative default (v7x-class)
    try:
        info = pltpu.get_tpu_info()
        vmem_cap = int(getattr(info, "vmem_capacity_bytes", vmem_cap))
    except Exception:
        pass
    if vmem_cap >= 96 * 1024 * 1024:                 # v5e / v6e: 128 MiB, single TC
        return 40 * 1024 * 1024, 64 * 1024 * 1024
    return 18 * 1024 * 1024, 32 * 1024 * 1024        # v7x class: 64 MiB per TC


def _choose_tile_n(n_texels, per_lane_col_bytes, vmem_budget):
    """Largest lane-multiple tile fitting the padded, double-buffered budget,
    while keeping an even number (>=2) of grid steps for megacore balance."""
    if n_texels < 2 * _LANE:
        return n_texels                              # single full-width block
    tile = max(_LANE, (vmem_budget // per_lane_col_bytes) // _LANE * _LANE)
    steps = max(2, pl.cdiv(n_texels, tile))
    if steps % 2:
        steps += 1
    tile = min(tile, _round_up_lane(pl.cdiv(n_texels, steps)))
    return max(tile, _LANE)


# --------------------------------------------------------------------------
# Kernel factory (specialized statically on the frozen mask of the live rows)
# --------------------------------------------------------------------------
def _live_store_plan(frozen_live):
    """Static plan of (dst_lo, dst_hi, source, src_lo) row segments for rows 3,10..12."""
    runs, li, fi = [], 0, 0
    for k, row in enumerate(LIVE_ROWS):
        if frozen_live[k]:
            runs.append((row, "froz", fi)); fi += 1
        else:
            runs.append((row, "live", li)); li += 1
    plan = []
    for row, src, si in runs:
        if plan and plan[-1][1] == row and plan[-1][2] == src:
            lo, _, s, slo = plan[-1]
            plan[-1] = (lo, row + 1, s, slo)
        else:
            plan.append((row, row + 1, src, si))
    return plan


def _make_brdf_kernel(frozen_live):
    n_live = sum(1 for f in frozen_live if not f)
    n_froz = len(frozen_live) - n_live
    plan = _live_store_plan(frozen_live)

    def kernel(*refs):
        i = 0
        live = froz = None
        if n_live:
            delta_ref, init_ref = refs[i], refs[i + 1]
            i += 2
        if n_froz:
            froz_ref = refs[i]
            i += 1
        out_ref = refs[i]
        t = out_ref.shape[-1]

        if n_live:
            # Only the data-dependent rows go through sin(); the clamp mirrors
            # the torch forward exactly (it is a no-op mathematically).
            live = jnp.clip((jnp.sin(delta_ref[...] + init_ref[...]) + 1.0) * 0.5,
                            0.0, 1.0)
        if n_froz:
            froz = froz_ref[...]

        # Constant rows forced every forward (identical to the torch no_grad block).
        out_ref[0:2, :] = jnp.zeros((2, t), dtype=out_ref.dtype)       # metallic, subsurface
        out_ref[2:3, :] = jnp.full((1, t), 0.5, dtype=out_ref.dtype)   # specular
        out_ref[4:10, :] = jnp.zeros((6, t), dtype=out_ref.dtype)      # specularTint..clearcoatGloss

        # Live rows (computed or frozen), merged into contiguous row segments.
        for dst_lo, dst_hi, src, src_lo in plan:
            block = live if src == "live" else froz
            out_ref[dst_lo:dst_hi, :] = block[src_lo:src_lo + (dst_hi - dst_lo), :]

    return kernel, n_live, n_froz


@functools.lru_cache(maxsize=None)
def _build_forward(n_texels, frozen_live):
    kernel, n_live, n_froz = _make_brdf_kernel(frozen_live)

    vmem_budget, vmem_limit = _vmem_plan()
    # bytes per lane-column: f32 * 2 buffers * (padded input rows + padded output rows)
    per_lane_bytes = 4 * 2 * (2 * _pad8(n_live) + _pad8(n_froz) + _pad8(N_PARAMS))
    tile_n = _choose_tile_n(n_texels, per_lane_bytes, vmem_budget)
    grid = (pl.cdiv(n_texels, tile_n),)

    in_specs = []
    if n_live:
        in_specs += [pl.BlockSpec((n_live, tile_n), lambda i: (0, i))] * 2
    if n_froz:
        in_specs += [pl.BlockSpec((n_froz, tile_n), lambda i: (0, i))]

    call = pl.pallas_call(
        kernel,
        out_shape=jax.ShapeDtypeStruct((N_PARAMS, n_texels), jnp.float32),
        grid_spec=pltpu.PrefetchScalarGridSpec(
            num_scalar_prefetch=0,
            grid=grid,
            in_specs=in_specs,
            out_specs=pl.BlockSpec((N_PARAMS, tile_n), lambda i: (0, i)),
        ),
        compiler_params=pltpu.CompilerParams(
            dimension_semantics=("parallel",),
            vmem_limit_bytes=vmem_limit,
        ),
    )
    return call, n_live, n_froz


# --------------------------------------------------------------------------
# set_mode()-time specialization + forward wrapper
# --------------------------------------------------------------------------
def make_disney_brdf_forward(n_texels, frozen_indices=None):
    """Builds the specialized forward for a given frozen mask (HOST data, as in
    set_mode()).  Returned forward(delta_live, init_live, frozen_live_vals=None)
    takes only device arrays (no host sync) and returns the param-major (13, N)
    BRDF (transpose of the PyTorch (N, 13) output)."""
    if frozen_indices is None:
        frozen_live = (False,) * len(LIVE_ROWS)
    else:
        fi = np.asarray(frozen_indices)
        frozen_live = tuple(bool(fi[r]) for r in LIVE_ROWS)

    call, n_live, n_froz = _build_forward(int(n_texels), frozen_live)

    def forward(delta_live, init_live, frozen_live_vals=None):
        args = []
        if n_live:
            args += [delta_live, init_live]
        if n_froz:
            assert frozen_live_vals is not None
            args += [frozen_live_vals]
        return call(*args)

    return forward, frozen_live


# --------------------------------------------------------------------------
# Parameter construction mirroring DisneyBRDFModel.__init__ (param-major layout)
# --------------------------------------------------------------------------
def build_disney_brdf_state(n_texels, initial_textures):
    base = jnp.array([0.0, 0.0, 0.5, 1.0, 0.0, 0.0, 0.0,
                      0.0, 0.0, 0.0, 0.3, 0.5, 0.35], dtype=jnp.float32)
    expand = jnp.tile(base[:, None], (1, n_texels))                    # (13, N)
    rgb = initial_textures[0].reshape(-1, 3).T                         # (3, N)
    rough = initial_textures[1].reshape(-1, initial_textures[1].shape[-1])[:, 1]
    expand = expand.at[-3:, :].set(rgb)
    expand = expand.at[3, :].set(rough)
    initial_brdf_params = jnp.arcsin(expand * 2.0 - 1.0)               # (13, N)

    brdf_params = jnp.zeros((N_PARAMS, n_texels), dtype=jnp.float32)   # nn.Parameter init
    frozen_indices = np.zeros((N_PARAMS,), dtype=np.int32)             # host-side mask
    frozen_param_values = jnp.zeros((N_PARAMS, n_texels), dtype=jnp.float32)
    return brdf_params, initial_brdf_params, frozen_param_values, frozen_indices


# --------------------------------------------------------------------------
# Plain-JAX reference in the PyTorch (n_texels, 13) layout
# --------------------------------------------------------------------------
def reference_forward(delta_nm, init_nm, frozen_vals_nm, frozen_idx):
    brdf = (jnp.sin(delta_nm + init_nm) + 1.0) / 2.0
    brdf = brdf.at[:, 0].set(0.0)
    brdf = brdf.at[:, 1].set(0.0)
    brdf = brdf.at[:, 2].set(0.5)
    brdf = brdf.at[:, 3].set(jnp.clip(brdf[:, 3], 0.0, 1.0))
    brdf = brdf.at[:, 4:10].set(0.0)
    brdf = brdf.at[:, -3:].set(jnp.clip(brdf[:, -3:], 0.0, 1.0))
    mask = (jnp.asarray(frozen_idx) > 0)[None, :]
    return jnp.where(mask, frozen_vals_nm, brdf)


# --------------------------------------------------------------------------
# Demo / correctness tests
# --------------------------------------------------------------------------
if __name__ == "__main__":
    root_key = jax.random.PRNGKey(0)

    def make_inputs(n_texels, H, W, salt):
        k1, k2, k3 = jax.random.split(jax.random.fold_in(root_key, salt), 3)
        tex_rgb = jax.random.uniform(k1, (H, W, 3), dtype=jnp.float32)
        tex_rough = jax.random.uniform(k2, (H, W, 2), dtype=jnp.float32)
        delta, init, _, _ = build_disney_brdf_state(n_texels, [tex_rgb, tex_rough])
        delta = 0.1 * jax.random.normal(k3, delta.shape, dtype=jnp.float32)
        return delta, init

    def run_mode(delta, init, frozen_idx_host, frozen_vals_full):
        n_texels = delta.shape[1]
        fwd, frozen_live = make_disney_brdf_forward(n_texels, frozen_idx_host)
        active = [r for r, f in zip(LIVE_ROWS, frozen_live) if not f]
        frozen = [r for r, f in zip(LIVE_ROWS, frozen_live) if f]
        args = [delta[np.array(active), :], init[np.array(active), :]]
        if frozen:
            args.append(frozen_vals_full[np.array(frozen), :])
        out = jax.block_until_ready(fwd(*args))
        idx = (frozen_idx_host if frozen_idx_host is not None
               else np.zeros(N_PARAMS, np.int32))
        ref = reference_forward(delta.T, init.T, frozen_vals_full.T, idx)
        np.testing.assert_allclose(np.asarray(out).T, np.asarray(ref),
                                   rtol=1e-6, atol=1e-6)
        return out

    # --- case 1: 'all' mode, 32x32 texture (lane-aligned, >=2 grid steps) -------
    delta, init = make_inputs(1024, 32, 32, salt=1)
    zeros_full = jnp.zeros((N_PARAMS, 1024), jnp.float32)
    out_all = run_mode(delta, init, None, zeros_full)

    # --- case 2: set_mode('diffuse') — rows 0..9 frozen to the captured forward -
    # (set_mode copies the current forced forward output, so frozen constant
    #  rows hold the constants and the frozen roughness row holds real data)
    frozen_vals = out_all
    idx_d = np.zeros(N_PARAMS, np.int32); idx_d[:10] = 1
    run_mode(delta, init, idx_d, frozen_vals)

    # --- case 3: set_mode('reflectance') — rgb rows frozen -----------------------
    idx_r = np.zeros(N_PARAMS, np.int32); idx_r[-3:] = 1
    run_mode(delta, init, idx_r, frozen_vals)

    # --- case 4: ragged texel count (1000, not a multiple of 128) ---------------
    delta_r, init_r = make_inputs(1000, 25, 40, salt=2)
    run_mode(delta_r, init_r, None, jnp.zeros((N_PARAMS, 1000), jnp.float32))

    # --- case 5: tiny texture (< one lane tile), single full-width block --------
    delta_t, init_t = make_inputs(96, 8, 12, salt=3)
    run_mode(delta_t, init_t, None, jnp.zeros((N_PARAMS, 96), jnp.float32))

    # TODO(synk): set_mode() optimizer bookkeeping and visualize_texture_gradient()
    # (imageio file I/O) are host-side training utilities with no kernel equivalent.
    print("KERNEL_OK")
</pallas_src>

<mosaic_0001>
module attributes {stable_mosaic.version = 11 : i64} {
  func.func @kernel(%arg0: i32, %arg1: memref<4x512xf32, #tpu.memory_space<vmem>>, %arg2: memref<4x512xf32, #tpu.memory_space<vmem>>, %arg3: memref<13x512xf32, #tpu.memory_space<vmem>>) attributes {dimension_semantics = [#tpu.dimension_semantics<parallel>], iteration_bounds = array<i64: 2>, scalar_prefetch = 0 : i64, scratch_operands = 0 : i64, tpu.core_type = #tpu.core_type<tc>, window_params = [{transform_indices = @transform_0, window_bounds = array<i64: 4, 512>}, {transform_indices = @transform_1, window_bounds = array<i64: 4, 512>}, {transform_indices = @transform_2, window_bounds = array<i64: 13, 512>}]} {
    %c0 = arith.constant 0 : index
    %c0_0 = arith.constant 0 : index
    %0 = vector.load %arg1[%c0, %c0_0] : memref<4x512xf32, #tpu.memory_space<vmem>>, vector<4x512xf32>
    %c0_1 = arith.constant 0 : index
    %c0_2 = arith.constant 0 : index
    %1 = vector.load %arg2[%c0_1, %c0_2] : memref<4x512xf32, #tpu.memory_space<vmem>>, vector<4x512xf32>
    %2 = arith.addf %0, %1 : vector<4x512xf32>
    %3 = math.sin %2 : vector<4x512xf32>
    %cst = arith.constant 1.000000e+00 : f32
    %4 = vector.broadcast %cst : f32 to vector<4x512xf32>
    %5 = arith.addf %3, %4 : vector<4x512xf32>
    %cst_3 = arith.constant 5.000000e-01 : f32
    %6 = vector.broadcast %cst_3 : f32 to vector<4x512xf32>
    %7 = arith.mulf %5, %6 : vector<4x512xf32>
    %cst_4 = arith.constant 0.000000e+00 : f32
    %cst_5 = arith.constant 1.000000e+00 : f32
    %8 = vector.broadcast %cst_4 : f32 to vector<4x512xf32>
    %9 = arith.maximumf %8, %7 : vector<4x512xf32>
    %10 = vector.broadcast %cst_5 : f32 to vector<4x512xf32>
    %11 = arith.minimumf %10, %9 : vector<4x512xf32>
    %cst_6 = arith.constant 0.000000e+00 : f32
    %12 = vector.broadcast %cst_6 : f32 to vector<2x512xf32>
    %c0_7 = arith.constant 0 : index
    %c0_8 = arith.constant 0 : index
    %13 = vector.load %arg3[%c0_7, %c0_8] : memref<13x512xf32, #tpu.memory_space<vmem>>, vector<2x512xf32>
    tpu.vector_store %arg3[%c0_7, %c0_8], %12 {strides = array<i32>} : memref<13x512xf32, #tpu.memory_space<vmem>>, vector<2x512xf32>,
    %cst_9 = arith.constant 5.000000e-01 : f32
    %14 = vector.broadcast %cst_9 : f32 to vector<1x512xf32>
    %c2 = arith.constant 2 : index
    %c0_10 = arith.constant 0 : index
    %15 = vector.load %arg3[%c2, %c0_10] : memref<13x512xf32, #tpu.memory_space<vmem>>, vector<1x512xf32>
    tpu.vector_store %arg3[%c2, %c0_10], %14 {strides = array<i32>} : memref<13x512xf32, #tpu.memory_space<vmem>>, vector<1x512xf32>,
    %cst_11 = arith.constant 0.000000e+00 : f32
    %16 = vector.broadcast %cst_11 : f32 to vector<6x512xf32>
    %c4 = arith.constant 4 : index
    %c0_12 = arith.constant 0 : index
    %17 = vector.load %arg3[%c4, %c0_12] : memref<13x512xf32, #tpu.memory_space<vmem>>, vector<6x512xf32>
    tpu.vector_store %arg3[%c4, %c0_12], %16 {strides = array<i32>} : memref<13x512xf32, #tpu.memory_space<vmem>>, vector<6x512xf32>,
    %18 = vector.extract_strided_slice %11 {offsets = [0, 0], sizes = [1, 512], strides = [1, 1]} : vector<4x512xf32> to vector<1x512xf32>
    %c3 = arith.constant 3 : index
    %c0_13 = arith.constant 0 : index
    %19 = vector.load %arg3[%c3, %c0_13] : memref<13x512xf32, #tpu.memory_space<vmem>>, vector<1x512xf32>
    tpu.vector_store %arg3[%c3, %c0_13], %18 {strides = array<i32>} : memref<13x512xf32, #tpu.memory_space<vmem>>, vector<1x512xf32>,
    %20 = vector.extract_strided_slice %11 {offsets = [1, 0], sizes = [3, 512], strides = [1, 1]} : vector<4x512xf32> to vector<3x512xf32>
    %c10 = arith.constant 10 : index
    %c0_14 = arith.constant 0 : index
    %21 = vector.load %arg3[%c10, %c0_14] : memref<13x512xf32, #tpu.memory_space<vmem>>, vector<3x512xf32>
    tpu.vector_store %arg3[%c10, %c0_14], %20 {strides = array<i32>} : memref<13x512xf32, #tpu.memory_space<vmem>>, vector<3x512xf32>,
    return
  }
  func.func @transform_0(%arg0: i32) -> (i32, i32) {
    %c0_i32 = arith.constant 0 : i32
    %c0_i32_0 = arith.constant 0 : i32
    return %c0_i32, %arg0 : i32, i32
  }
  func.func @transform_1(%arg0: i32) -> (i32, i32) {
    %c0_i32 = arith.constant 0 : i32
    %c0_i32_0 = arith.constant 0 : i32
    return %c0_i32, %arg0 : i32, i32
  }
  func.func @transform_2(%arg0: i32) -> (i32, i32) {
    %c0_i32 = arith.constant 0 : i32
    %c0_i32_0 = arith.constant 0 : i32
    return %c0_i32, %arg0 : i32, i32
  }
}

</mosaic_0001>

<bundles_post_ra>
// kernel: tpu_custom_call.1
= control target key start
LH: loop header
LB: loop body
LE: loop exit
PB: predicated region body
PF: predicated region fallthrough
CT: control target
= control target key end

     0   :  { %7 = vsyncpa [#allocation3], 0  ;;  %s1178_s0 = inlined_call_operand.hbm [shape: f32[4,1024], index: 0, kind: input, shape index: {}]   ;;  %s1179_s1 = inlined_call_operand.hbm [shape: f32[4,1024], index: 1, kind: input, shape index: {}]   ;;  %s1180_s2 = inlined_call_operand.hbm [shape: f32[13,1024], index: 2, kind: output, shape index: {}]  }
   0x1   :  { %9 = vsyncpa [#allocation3 + $0x1], 0 }
   0x2   :  { %10 = vsyncpa [#allocation6], 0 }
   0x3   :  { %12 = vsyncpa [#allocation6 + $0x1], 0 }
   0x4   :  { %13 = vsyncpa [#allocation4], 0 }
   0x5   :  { %15 = vsyncpa [#allocation4 + $0x1], 0  ;;  %s860_s9 = smov 0   ;;  %s862_s10 = smov 0  }
   0x6   :  { %s864_s11 = smov 0   ;;  %s866_s12 = smov 0  }
   0x7 LB: > { %s881_s13 = sadd.s32 4294967295, %s828_s12   ;;  %s594_s14 = sadd.s32 4294967294, %s828_s12   ;;  %s828_s12 = sphi %s866_s12, %s1203_s12   ;;  %s824_s11 = sphi %s864_s11, %s1202_s11   ;;  %s820_s10 = sphi %s862_s10, %s1201_s10   ;;  %s816_s9 = sphi %s860_s9, %s1200_s9  }
   0x8   : > { %s885_s15 = sadd.s32 1, %s828_s12   ;;  %s28_s16 = sadd.s32 1, %s824_s11 }
   0x9   : > { %s25_s17 = ssub.s32 %s828_s12, %s885_s15  ;;  %p35_p0 = scmp.ne.s32.totalorder %s824_s11, %s820_s10 }
   0xa   : > { %p26_p1 = scmp.eq.s32.totalorder %s25_s17, 0  ;;  %p36_p2 = scmp.eq.s32.totalorder %s828_s12, 0 }
   0xb   : > { %p41_p3 = scmp.ne.s32.totalorder %s820_s10, %s816_s9  ;;  %p42_p4 = scmp.eq.s32.totalorder %s881_s13, 0 }
   0xc   : > { %s897_s18 = scalar_select %p26_p1, %s824_s11, %s28_s16  }
   0xd   : > { %p899_p5 = por %p36_p2, %p35_p0  ;;  %p903_p6 = por %p42_p4, %p41_p3 }
   0xe   : > { %p91_p7 = scmp.eq.s32.totalorder %s881_s13, 1  ;;  %p97_p8 = scmp.eq.s32.totalorder %s594_s14, 1 }
   0xf   : > { %s1184_s20 = scalar_select %p903_p6, 1, 0 }
  0x10   : > { %p650_p10 = scmp.lt.s32.totalorder %s828_s12, 2  ;;  %p910_p11 = por %p91_p7, %p35_p0 }
  0x11   : > { %p914_p12 = por %p97_p8, %p41_p3  ;;  %s919_s23 = sand.u32 1, %s824_s11  }
  0x12   : > { %s1185_s21 = scalar_select %p910_p11, 1, 0 }
  0x13   : > { %s1186_s22 = scalar_select %p914_p12, 1, 0 }
  0x14   : > { %s622_s24 = sshll.u32 %s828_s12, 8  ;;  %s597_s25 = sshll.u32 %s919_s23, 4 }
  0x15   : > { %s928_s28 = scalar_lea.hbm %s1178_s0, %s622_s24  ;;  %s121_s29 = scalar_lea.vmem [#allocation2], %s597_s25 }
  0x16   : > { %s129_s30 = sshll.u32 %s121_s29, 4  ;;  %p934_p13 = pnand %p650_p10, %p899_p5  ;;  %s938_s30 = int_to_ptr.vmem [resolvable:$true] %s129_s30 }
  0x17   : > { %s118_s4 = scalar_lea.sflag [#allocation3], %s919_s23  ;;  %s704_s5 = scalar_lea.hbm %s928_s28, 256 }
  0x18   : > { %p705_p2 = scmp.ne.s32.totalorder %s928_s28, %s704_s5  ;;  %p706_p3 = pneg %p934_p13 }
  0x19   : > { %s709_s8 = scalar_lea.hbm %s1178_s0, 512  ;;  %p710_p5 = scmp.lt.s32.totalorder %s928_s28, %s1178_s0 }
  0x1a   : > { %p707_p4 = pnand %p706_p3, %p705_p2  ;;  %p711_p8 = scmp.lt.s32.totalorder %s709_s8, %s704_s5 }
  0x1c   : > { %p708_p7 = pneg %p707_p4  ;;  %p712_p10 = por %p711_p8, %p710_p5 }
  0x1e   : > { %p713_p9 = pnand %p712_p10, %p708_p7 }
  0x20   : > { %716 = shalt.err (!%p713_p9)
}
  0x21   : > { %s717_s17 = scalar_lea.vmem %s938_s30, 256  ;;  %s830_s19 = smov [#allocation2]  }
  0x22   : > { %p718_p0 = scmp.ne.s32.totalorder %s938_s30, %s717_s17  ;;  %s722_s26 = sshll.u32 %s830_s19, 4  ;;  %s723_s26 = int_to_ptr.vmem [resolvable:$false] %s722_s26 }
  0x23   : > { %s724_s27 = scalar_lea.vmem %s723_s26, 512  ;;  %p725_p1 = scmp.lt.s32.totalorder %s938_s30, %s723_s26 }
  0x24   : > { %p720_p2 = pnand %p718_p0, %p706_p3  ;;  %p726_p12 = scmp.lt.s32.totalorder %s724_s27, %s717_s17 }
  0x26   : > { %p721_p4 = pneg %p720_p2  ;;  %p727_p11 = por %p726_p12, %p725_p1 }
  0x28   : > { %p728_p5 = pnand %p727_p11, %p721_p4 }
  0x2a   : > { %731 = shalt.err (!%p728_p5)
}
  0x2b   : > { %642 = dma.hbm_to_vmem [thread:$0]  (!%p934_p13), %s928_s28, 256, %s938_s30, %s118_s4  }
  0x2c   : > { %p1188_p9 = scmp.lt.s32.totalorder %s828_s12, 3  ;;  %p1189_p0 = scmp.ge.s32.totalorder %s828_s12, 1 }
  0x2d   : > { %s980_s7 = scalar_lea.hbm %s1179_s1, %s622_s24  ;;  %s140_s8 = scalar_lea.vmem [#allocation5], %s597_s25 }
  0x2e   : > { %p971_p7 = pnand %p1189_p0, %p1188_p9  ;;  %s148_s14 = sshll.u32 %s140_s8, 4  ;;  %s149_s14 = int_to_ptr.vmem [resolvable:$true] %s148_s14 }
  0x2f   : > { %s137_s28 = scalar_lea.sflag [#allocation6], %s919_s23  ;;  %s732_s30 = scalar_lea.hbm %s980_s7, 256 }
  0x30   : > { %s1190_s29 = scalar_select %p971_p7, 1, 0 }
  0x31   : > { %p733_p11 = scmp.ne.s32.totalorder %s980_s7, %s732_s30  ;;  %s737_s17 = scalar_lea.hbm %s1179_s1, 512 }
  0x32   : > { %p738_p8 = scmp.lt.s32.totalorder %s980_s7, %s1179_s1  ;;  %p739_p10 = scmp.lt.s32.totalorder %s737_s17, %s732_s30 }
  0x33   : > { %p735_p12 = pnand %p733_p11, %p706_p3 }
  0x34   : > { %p740_p2 = por %p739_p10, %p738_p8 }
  0x35   : > { %p736_p1 = pneg %p735_p12 }
  0x37   : > { %p741_p4 = pnand %p740_p2, %p736_p1 }
  0x39   : > { %744 = shalt.err (!%p741_p4)
}
  0x3a   : > { %s745_s25 = scalar_lea.vmem %s149_s14, 256  ;;  %s831_s23 = smov [#allocation5]  }
  0x3b   : > { %p746_p5 = scmp.ne.s32.totalorder %s149_s14, %s745_s25  ;;  %s750_s26 = sshll.u32 %s831_s23, 4  ;;  %s751_s26 = int_to_ptr.vmem [resolvable:$false] %s750_s26 }
  0x3c   : > { %s752_s27 = scalar_lea.vmem %s751_s26, 512  ;;  %p753_p11 = scmp.lt.s32.totalorder %s149_s14, %s751_s26 }
  0x3d   : > { %p748_p9 = pnand %p746_p5, %p706_p3  ;;  %p754_p12 = scmp.lt.s32.totalorder %s752_s27, %s745_s25 }
  0x3f   : > { %p749_p0 = pneg %p748_p9  ;;  %p755_p6 = por %p754_p12, %p753_p11 }
  0x41   : > { %p756_p7 = pnand %p755_p6, %p749_p0 }
  0x43   : > { %759 = shalt.err (!%p756_p7)
}
  0x44   : > { %645 = dma.hbm_to_vmem [thread:$0]  (!%p934_p13), %s980_s7, 256, %s149_s14, %s137_s28  }
  0x45   : > { %p1191_p1 = scmp.ne.s32.totalorder %s1190_s29, 0 }
  0x46   : > { %s1006_s5 = sand.u32 (!%p1191_p1), 1, %s820_s10   ;;  %p1192_p3 = scmp.ne.s32.totalorder (!%p1191_p1), %s1184_s20, 0 }
  0x47   : > { %157 = sbr.rel (%p1191_p1) target bundleno = 205 (0xcd), region = 28  ;;  %s604_s6 = sshll.u32 (!%p1191_p1), %s1006_s5, 4 }
  0x48   : > { %s160_s8 = scalar_lea.sflag (!%p1191_p1), [#allocation3], %s1006_s5  ;;  %s163_s30 = scalar_lea.vmem (!%p1191_p1), [#allocation2], %s604_s6 }
  0x4c   : > { %803 = dma.done.wait (%p1192_p3), %s160_s8, 256  }
  0x4d   : > { %805 = vsyncadd (%p1192_p3), %s160_s8, 4294967040  ;;  %s169_s3 = scalar_lea.sflag [#allocation6], %s1006_s5  ;;  %s172_s7 = scalar_lea.vmem [#allocation5], %s604_s6 }
  0x4e   : > { %807 = dma.done.wait (%p1192_p3), %s169_s3, 256  }
  0x4f   : > { %809 = vsyncadd (%p1192_p3), %s169_s3, 4294967040  ;;  %s606_s29 = sshll.u32 %s1006_s5, 6  ;;  %v427_v0 = vlaneseq  ;;  %v832_v1 = vmov 0.0   ;;  %v833_v3 = vmov 0.5   ;;  %v201_v4 = vld [vmem:[%s163_s30] sm:$0xff]  ;;  %v202_v5 = vld [vmem:[%s163_s30 + $0x8] sm:$0xff] }
  0x50   : > { %s1020_s14 = scalar_lea.vmem [#allocation7], %s606_s29  ;;  %v203_v6 = vld [vmem:[%s172_s7] sm:$0xff]  ;;  %v204_v7 = vld [vmem:[%s172_s7 + $0x8] sm:$0xff]  ;;  %v834_v32 = vmov 683565275   ;;  %s624_s20 = sshll.u32 %s881_s13, 9 }
  0x51   : > { %423 = vst [vmem:[%s1020_s14] sm:$0x3] %v832_v1  ;;  %424 = vst [vmem:[%s1020_s14 + $0x8] sm:$0x3] %v832_v1  ;;  %vm1035_vm0 = vcmp.lt.s32.totalorder %v427_v0, 512  ;;  %v1042_v8 = vadd.f32 %v203_v6, %v201_v4  ;;  %v1044_v9 = vadd.f32 %v204_v7, %v202_v5  ;;  %v835_v34 = vmov 2475754826   ;;  %s1129_s17 = scalar_lea.hbm %s1180_s2, %s624_s20 }
  0x52   : > { %425 = vst [vmem:[%s1020_s14 + $0x10] sm:$0x3] %v832_v1  ;;  %426 = vst [vmem:[%s1020_s14 + $0x18] sm:$0x3] %v832_v1  ;;  %v836_v36 = vmov 2131351028  }
  0x53   : > { %434 = vst [vmem:[%s1020_s14] sm:$0xf0] %v832_v1  ;;  %435 = vst [vmem:[%s1020_s14 + $0x8] sm:$0xf0] %v832_v1  ;;  %v207_v10 = vand.u32 2147483647, %v1042_v8  ;;  %v210_v11 = vand.u32 2139095040, %v1042_v8 }
  0x54   : > { %436 = vst [vmem:[%s1020_s14 + $0x10] sm:$0xf0] %v832_v1  ;;  %437 = vst [vmem:[%s1020_s14 + $0x18] sm:$0xf0] %v832_v1  ;;  %v311_v12 = vand.u32 2147483647, %v1044_v9 }
  0x55   : > { %438 = vst [vmem:[%s1020_s14 + $0x20] sm:$0x3] %v832_v1  ;;  %439 = vst [vmem:[%s1020_s14 + $0x28] sm:$0x3] %v832_v1  ;;  %v314_v13 = vand.u32 2139095040, %v1044_v9  ;;  %v211_v14 = vshrl.u32 %v210_v11, 23 }
  0x56   : > { %440 = vst [vmem:[%s1020_s14 + $0x30] sm:$0x3] %v832_v1  ;;  %441 = vst [vmem:[%s1020_s14 + $0x38] sm:$0x3] %v832_v1  ;;  %v214_v15 = vand.u32 8388607, %v207_v10 }
  0x57   : > { %615 = vst.msk [vmem:[%s1020_s14 + $0x2] ss:$8 sm:$0xf] %vm1035_vm0, %v833_v3  ;;  %v315_v16 = vshrl.u32 %v314_v13, 23  ;;  %v318_v17 = vand.u32 8388607, %v311_v12 }
  0x58   : > { %v607_v18 = vadd.s32 4294967169, %v211_v14  ;;  %v215_v21 = vor.u32 8388608, %v214_v15  ;;  %v837_v38 = vmov 2102212464   ;;  %v838_v40 = vmov 920167782  }
  0x59   : > { %v611_v19 = vadd.s32 4294967169, %v315_v16  ;;  %v319_v22 = vor.u32 8388608, %v318_v17  ;;  %v839_v48 = vmov 1326507024   ;;  %vm209_vm15 = vcmp.lt.s32.totalorder %v1042_v8, 0  ;;  %s498_s28 = sshll.u32 %s1020_s14, 4  ;;  %s1131_s28 = int_to_ptr.vmem [resolvable:$true] %s498_s28 }
  0x5a   : > { %v217_v20 = vadd.s32 1, %v607_v18  ;;  %v1054_v28 = vshll.u32 %v215_v21, 8  ;;  %s485_s13 = scalar_lea.sflag [#allocation4], %s1006_s5  ;;  %s760_s24 = scalar_lea.vmem %s1131_s28, 1024 }
  0x5b   : > { %v321_v23 = vadd.s32 1, %v611_v19  ;;  %v1056_v30 = vshll.u32 %v319_v22, 8  ;;  %p761_p6 = scmp.ne.s32.totalorder %s1131_s28, %s760_s24  ;;  %p1197_p13 = scmp.ne.s32.totalorder %s1185_s21, 0 }
  0x5c   : > { %vm218_vm1 = vcmp.gt.s32.totalorder %v217_v20, 0  ;;  %s841_s19 = smov [#allocation7]  }
  0x5d   : > { %v219_v24 = vsel %vm218_vm1, %v217_v20, 0  ;;  %vm322_vm2 = vcmp.gt.s32.totalorder %v321_v23, 0  ;;  %vm1105_vm1 = vcmp.le.f32.partialorder %v207_v10, 0.7853982  ;;  %p762_p7 = pnand %p761_p6, %p1197_p13  ;;  %s764_s25 = sshll.u32 %s841_s19, 4  ;;  %s765_s25 = int_to_ptr.vmem [resolvable:$false] %s764_s25 }
  0x5e   : > { %v220_v25 = vshrl.u32 %v219_v24, 5  ;;  %v221_v26 = vand.u32 31, %v219_v24  ;;  %v323_v27 = vsel %vm322_vm2, %v321_v23, 0  ;;  %vm313_vm2 = vcmp.lt.s32.totalorder %v1044_v9, 0  ;;  %s766_s23 = scalar_lea.vmem %s765_s25, 2048  ;;  %p767_p10 = scmp.lt.s32.totalorder %s1131_s28, %s765_s25 }
  0x5f   : > { %v325_v29 = vand.u32 31, %v323_v27  ;;  %v1058_v42 = vshrl.u32 %v323_v27, 5  ;;  %p763_p8 = pneg %p762_p7  ;;  %p768_p2 = scmp.lt.s32.totalorder %s766_s23, %s760_s24 }
  0x60   : > { %v222_v31 = vsub.s32 32, %v221_v26  ;;  %v224_v33 = vshll.u32 %v834_v32, %v221_v26  ;;  %v227_v35 = vshll.u32 %v835_v34, %v221_v26  ;;  %v230_v37 = vshll.u32 %v836_v36, %v221_v26 }
  0x61   : > { %v233_v39 = vshll.u32 %v837_v38, %v221_v26  ;;  %v236_v41 = vshll.u32 %v838_v40, %v221_v26  ;;  %vm239_vm3 = vcmp.lt.s32.totalorder %v220_v25, 1  ;;  %vm240_vm4 = vcmp.lt.s32.totalorder %v220_v25, 2  ;;  %p769_p4 = por %p768_p2, %p767_p10 }
  0x62   : > { %v223_v43 = vshrl.u32 %v834_v32, %v222_v31  ;;  %v225_v44 = vshrl.u32 %v835_v34, %v222_v31  ;;  %v228_v45 = vshrl.u32 %v836_v36, %v222_v31  ;;  %v231_v46 = vshrl.u32 %v837_v38, %v222_v31 }
  0x63   : > { %v234_v47 = vshrl.u32 %v838_v40, %v222_v31  ;;  %v237_v49 = vshrl.u32 %v839_v48, %v222_v31  ;;  %vm242_vm5 = vcmp.lt.s32.totalorder %v220_v25, 4  ;;  %v326_v53 = vsub.s32 32, %v325_v29  ;;  %p770_p5 = pnand %p769_p4, %p763_p8 }
  0x64   : > { %v226_v50 = vor.u32 %v225_v44, %v224_v33  ;;  %v229_v51 = vor.u32 %v228_v45, %v227_v35  ;;  %v232_v52 = vor.u32 %v231_v46, %v230_v37  ;;  %vm241_vm6 = vcmp.lt.s32.totalorder %v220_v25, 3 }
  0x65   : > { %v235_v54 = vor.u32 %v234_v47, %v233_v39  ;;  %v238_v55 = vor.u32 %v237_v49, %v236_v41  ;;  %v328_v56 = vshll.u32 %v834_v32, %v325_v29  ;;  %v331_v1 = vshll.u32 %v835_v34, %v325_v29 }
  0x66   : > { %v243_v57 = vsel %vm239_vm3, %v223_v43, %v226_v50  ;;  %v244_v58 = vsel %vm242_vm5, %v232_v52, 2102212464  ;;  %v247_v59 = vsel %vm239_vm3, %v226_v50, %v229_v51  ;;  %v251_v60 = vsel %vm239_vm3, %v229_v51, %v232_v52 }
  0x67   : > { %v245_v61 = vsel %vm241_vm6, %v229_v51, %v244_v58  ;;  %v248_v62 = vsel %vm242_vm5, %v235_v54, 920167782  ;;  %v252_v63 = vsel %vm242_vm5, %v238_v55, 1326507024  ;;  %v327_v5 = vshrl.u32 %v834_v32, %v326_v53 }
  0x68   : > { %v249_v3 = vsel %vm241_vm6, %v232_v52, %v248_v62  ;;  %v253_v4 = vsel %vm241_vm6, %v235_v54, %v252_v63  ;;  %v329_v6 = vshrl.u32 %v835_v34, %v326_v53  ;;  %v246_v7 = vsel %vm240_vm4, %v243_v57, %v245_v61 }
  0x69   : > { %v250_v11 = vsel %vm240_vm4, %v247_v59, %v249_v3  ;;  %v254_v13 = vsel %vm240_vm4, %v251_v60, %v253_v4  ;;  %v332_v14 = vshrl.u32 %v836_v36, %v326_v53  ;;  %v334_v21 = vshll.u32 %v836_v36, %v325_v29 }
  0x6a   : > { %v1067_v15 = vmul.u32.u64.low %v1054_v28, %v254_v13  ;;  %v1068_v16 = vmul.u32.u64.high %v1054_v28, %v254_v13, %v1067_v15  ;;  %v1071_v17 = vmul.u32.u64.low %v1054_v28, %v250_v11  ;;  %v1072_v18 = vmul.u32.u64.high %v1054_v28, %v250_v11, %v1071_v17 }
  0x6b   : > { %v330_v19 = vor.u32 %v329_v6, %v328_v56  ;;  %v333_v20 = vor.u32 %v332_v14, %v331_v1  ;;  %v335_v22 = vshrl.u32 %v837_v38, %v326_v53  ;;  %v337_v23 = vshll.u32 %v837_v38, %v325_v29 }
  0x6c   : > { %v338_v24 = vshrl.u32 %v838_v40, %v326_v53  ;;  %v340_v26 = vshll.u32 %v838_v40, %v325_v29  ;;  %v341_v27 = vshrl.u32 %v839_v48, %v326_v53  ;;  %v262_v25 = vmul.u32 %v1054_v28, %v246_v7 }
  0x6d   : > { %v336_v31 = vor.u32 %v335_v22, %v334_v21  ;;  %vm343_vm7 = vcmp.lt.s32.totalorder %v1058_v42, 1  ;;  %vm344_vm8 = vcmp.lt.s32.totalorder %v1058_v42, 2  ;;  %vm264_vm9 = vc.u32 %v1068_v16, %v1071_v17 }
  0x6e   : > { %v265_v32 = vadd.s32 1, %v1072_v18  ;;  %v339_v33 = vor.u32 %v338_v24, %v337_v23  ;;  %vm345_vm10 = vcmp.lt.s32.totalorder %v1058_v42, 3  ;;  %v342_v34 = vor.u32 %v341_v27, %v340_v26 }
  0x6f   : > { %vm346_vm11 = vcmp.lt.s32.totalorder %v1058_v42, 4  ;;  %v347_v35 = vsel %vm343_vm7, %v327_v5, %v330_v19  ;;  %v351_v29 = vsel %vm343_vm7, %v330_v19, %v333_v20  ;;  %v355_v38 = vsel %vm343_vm7, %v333_v20, %v336_v31 }
  0x70   : > { %v266_v36 = vsel %vm264_vm9, %v265_v32, %v1072_v18  ;;  %v348_v28 = vsel %vm346_vm11, %v336_v31, 2102212464  ;;  %v352_v37 = vsel %vm346_vm11, %v339_v33, 920167782  ;;  %v356_v43 = vsel %vm346_vm11, %v342_v34, 1326507024 }
  0x71   : > { %v267_v39 = vadd.s32 %v266_v36, %v262_v25  ;;  %v349_v40 = vsel %vm345_vm10, %v333_v20, %v348_v28  ;;  %v353_v41 = vsel %vm345_vm10, %v336_v31, %v352_v37  ;;  %v357_v46 = vsel %vm345_vm10, %v339_v33, %v356_v43 }
  0x72   : > { %v350_v44 = vsel %vm344_vm8, %v347_v35, %v349_v40  ;;  %v354_v45 = vsel %vm344_vm8, %v351_v29, %v353_v41  ;;  %v358_v48 = vsel %vm344_vm8, %v355_v38, %v357_v46  ;;  %v263_v5 = vadd.s32 %v1071_v17, %v1068_v16 }
  0x73   : > { %v268_v47 = vadd.s32 536870912, %v267_v39  ;;  %v1089_v49 = vmul.u32.u64.low %v1056_v30, %v354_v45  ;;  %v1090_v50 = vmul.u32.u64.high %v1056_v30, %v354_v45, %v1089_v49  ;;  %v366_v54 = vmul.u32 %v1056_v30, %v350_v44 }
  0x74   : > { %v1093_v51 = vmul.u32.u64.low %v1056_v30, %v358_v48  ;;  %v1094_v52 = vmul.u32.u64.high %v1056_v30, %v358_v48, %v1093_v51  ;;  %vm312_vm3 = vcmp.le.f32.partialorder %v311_v12, 0.7853982  ;;  %vm299_vm7 = vweird.f32 %v1042_v8 }
  0x75   : > { %v269_v53 = vshrl.u32 %v268_v47, 30  ;;  %v369_v56 = vadd.s32 1, %v1090_v50  ;;  %vm403_vm11 = vweird.f32 %v1044_v9 }
  0x76   : > { %vm368_vm12 = vc.u32 %v1094_v52, %v1089_v49  ;;  %v367_v26 = vadd.s32 %v1089_v49, %v1094_v52 }
  0x77   : > { %v270_v55 = vshll.u32 %v269_v53, 30  ;;  %v370_v42 = vsel %vm368_vm12, %v369_v56, %v1090_v50  ;;  %v293_v33 = vsub.s32 4, %v269_v53 }
  0x78   : > { %v371_v58 = vadd.s32 %v370_v42, %v366_v54 }
  0x79   : > { %v271_v57 = vsub.s32 %v267_v39, %v270_v55  ;;  %v294_v39 = vsel %vm209_vm15, %v293_v33, %v269_v53 }
  0x7a   : > { %v372_v60 = vadd.s32 536870912, %v371_v58  ;;  %v296_v10 = vsel %vm1105_vm1, 0, %v294_v39 }
  0x7b   : > { %v273_v59 = vsub.s32 0, %v271_v57  ;;  %v300_v47 = vadd.s32 3, %v296_v10 }
  0x7c   : > { %v373_v62 = vshrl.u32 %v372_v60, 30 }
  0x7d   : > { %v608_v61 = vmin.u32 %v273_v59, %v271_v57  ;;  %v301_v52 = vand.u32 3, %v300_v47 }
  0x7e   : > { %v374_v1 = vshll.u32 %v373_v62, 30  ;;  %v397_v46 = vsub.s32 4, %v373_v62 }
  0x7f   : > { %v275_v63 = vclz %v608_v61  ;;  %vm306_vm4 = vcmp.eq.s32.totalorder %v301_v52, 2  ;;  %vm303_vm5 = vcmp.eq.s32.totalorder %v301_v52, 0  ;;  %vm302_vm6 = vcmp.lt.s32.totalorder %v301_v52, 2 }
  0x80   : > { %v375_v4 = vsub.s32 %v371_v58, %v374_v1  ;;  %v398_v50 = vsel %vm313_vm2, %v397_v46, %v373_v62  ;;  %v840_v58 = vmov 1966171168  }
  0x81   : > { %v609_v3 = vadd.s32 4294967294, %v275_v63  ;;  %v400_v53 = vsel %vm312_vm3, 0, %v398_v50  ;;  %v445_v59 = vunpack.c.l.s4 %v840_v58 }
  0x82   : > { %v377_v6 = vsub.s32 0, %v375_v4 }
  0x83   : > { %vm610_vm13 = vcmp.lt.s32.totalorder %v609_v3, 0  ;;  %v446_v1 = vunpack.c.0.s8 %v445_v59 }
  0x84   : > { %v278_v30 = vsel %vm610_vm13, 0, %v609_v3  ;;  %v612_v14 = vmin.u32 %v377_v6, %v375_v4  ;;  %v448_v3 = vshrl.u32 %v427_v0, 7 }
  0x85   : > { %v279_v7 = vsub.s32 32, %v278_v30  ;;  %v280_v11 = vshll.u32 %v271_v57, %v278_v30  ;;  %v283_v13 = vsub.s32 4294967266, %v278_v30  ;;  %v404_v57 = vadd.s32 3, %v400_v53 }
  0x86   : > { %v379_v19 = vclz %v612_v14 }
  0x87   : > { %v281_v15 = vshrl.u32 %v263_v5, %v279_v7  ;;  %v284_v18 = vadd.s32 127, %v283_v13  ;;  %v405_v62 = vand.u32 3, %v404_v57 }
  0x88   : > { %v613_v22 = vadd.s32 4294967294, %v379_v19 }
  0x89   : > { %v282_v20 = vor.u32 %v281_v15, %v280_v11  ;;  %v285_v21 = vshll.u32 %v284_v18, 23  ;;  %vm410_vm8 = vcmp.eq.s32.totalorder %v405_v62, 2  ;;  %vm407_vm9 = vcmp.eq.s32.totalorder %v405_v62, 0 }
  0x8a   : > { %vm614_vm14 = vcmp.lt.s32.totalorder %v613_v22, 0  ;;  %v449_v11 = vsub.s32 %v446_v1, %v448_v3  ;;  %vm406_vm10 = vcmp.lt.s32.totalorder %v405_v62, 2 }
  0x8b   : > { %v286_v23 = vor.u32 4788187, %v285_v21  ;;  %v289_v24 = vcvt.s32.f32 %v282_v20  ;;  %v382_v16 = vsel %vm614_vm14, 0, %v613_v22 }
  0x8c   : > { %v383_v17 = vsub.s32 32, %v382_v16  ;;  %v384_v25 = vshll.u32 %v375_v4, %v382_v16  ;;  %v387_v31 = vsub.s32 4294967266, %v382_v16 }
  0x8d   : > { %v287_v27 = vand.u32 2147483647, %v286_v23 }
  0x8e   : > { %v385_v34 = vshrl.u32 %v367_v26, %v383_v17  ;;  %v388_v35 = vadd.s32 127, %v387_v31 }
  0x8f   : > { %v290_v32 = vmul.f32 %v289_v24, %v287_v27 }
  0x90   : > { %v386_v28 = vor.u32 %v385_v34, %v384_v25  ;;  %v389_v37 = vshll.u32 %v388_v35, 23 }
  0x91   : > { %v291_v36 = vxor.u32 2147483648, %v290_v32 }
  0x92   : > { %v390_v41 = vor.u32 4788187, %v389_v37  ;;  %v393_v43 = vcvt.s32.f32 %v386_v28 }
  0x93   : > { %v292_v38 = vsel %vm209_vm15, %v291_v36, %v290_v32 }
  0x94   : > { %v295_v40 = vsel %vm1105_vm1, %v1042_v8, %v292_v38  ;;  %v391_v44 = vand.u32 2147483647, %v390_v41 }
  0x95   : > { %696 = vcosq.f32 %v295_v40 }
  0x96   : > { %698 = vsinq.f32 %v295_v40  ;;  %v394_v45 = vmul.f32 %v393_v43, %v391_v44 }
  0x98   : > { %v395_v48 = vxor.u32 2147483648, %v394_v45 }
  0x9a   : > { %v396_v49 = vsel %vm313_vm2, %v395_v48, %v394_v45 }
  0x9b   : > { %v399_v51 = vsel %vm312_vm3, %v1044_v9, %v396_v49 }
  0x9c   : > { %700 = vcosq.f32 %v399_v51 }
  0x9d   : > { %702 = vsinq.f32 %v399_v51 }
  0xa2   : > { %v697_v54 = vpop.eup %696 }
  0xa3   : > { %v699_v55 = vpop.eup %698  ;;  %v307_v56 = vxor.u32 2147483648, %v697_v54 }
  0xa4   : > { %v304_v42 = vxor.u32 2147483648, %v699_v55 }
  0xa5   : > { %v308_v12 = vsel %vm306_vm4, %v307_v56, %v699_v55 }
  0xa6   : > { %v305_v60 = vsel %vm303_vm5, %v697_v54, %v304_v42 }
  0xa7   : > { %v309_v61 = vsel %vm302_vm6, %v305_v60, %v308_v12 }
  0xa8   : > { %v310_v63 = vsel %vm299_vm7, nan, %v309_v61 }
  0xa9   : > { %v415_v4 = vadd.f32 1.0, %v310_v63  ;;  %v701_v5 = vpop.eup %700 }
  0xaa   : > { %v703_v6 = vpop.eup %702  ;;  %v411_v7 = vxor.u32 2147483648, %v701_v5 }
  0xab   : > { %v417_v30 = vmul.f32 0.5, %v415_v4  ;;  %v408_v8 = vxor.u32 2147483648, %v703_v6 }
  0xac   : > { %v412_v14 = vsel %vm410_vm8, %v411_v7, %v703_v6 }
  0xad   : > { %v419_v13 = vmax.f32 %v417_v30, 0.0  ;;  %v409_v15 = vsel %vm407_vm9, %v701_v5, %v408_v8 }
  0xae   : > { %v413_v0 = vsel %vm406_vm10, %v409_v15, %v412_v14 }
  0xaf   : > { %v421_v18 = vmin.f32 %v419_v13, 1.0  ;;  %v414_v19 = vsel %vm403_vm11, nan, %v413_v0 }
  0xb0   : > { %v416_v23 = vadd.f32 1.0, %v414_v19 }
  0xb1   : > { %v450_v20 = vrot.slane %v421_v18, %v449_v11  ;;  %v472_v21 = vrot.slane %v421_v18, 7  ;;  %v470_v22 = vcombine.high %v421_v18, %v421_v18 }
  0xb2   : > { %v418_v26 = vmul.f32 0.5, %v416_v23 }
  0xb3   : > { %480 = vst [vmem:[%s1020_s14 + $0x20] sm:$0x1c] %v472_v21  ;;  %v473_v24 = vrot.slane %v470_v22, 7 }
  0xb4   : > { %v420_v9 = vmax.f32 %v418_v26, 0.0 }
  0xb5   : > { %481 = vst [vmem:[%s1020_s14 + $0x28] sm:$0x1c] %v473_v24 }
  0xb6   : > { %v422_v27 = vmin.f32 %v420_v9, 1.0 }
  0xb8   : > { %v457_v16 = vrot.slane %v422_v27, %v449_v11  ;;  %v474_v17 = vrot.slane %v422_v27, 7  ;;  %v471_v25 = vcombine.high %v422_v27, %v422_v27 }
  0xba   : > { %v458_v31 = vcombine.low %v450_v20, %v457_v16  ;;  %482 = vst [vmem:[%s1020_s14 + $0x30] sm:$0x1c] %v474_v17  ;;  %v475_v32 = vrot.slane %v471_v25, 7 }
  0xbc   : > { %v465_v33 = vrot.slane %v458_v31, %v449_v11  ;;  %483 = vst [vmem:[%s1020_s14 + $0x38] sm:$0x1c] %v475_v32 }
  0xbe   : > { %616 = vst.msk [vmem:[%s1020_s14 + $0x3] ss:$8 sm:$0xf] %vm1035_vm0, %v465_v33 }
  0xbf   : > { %773 = shalt.err (!%p770_p5)
}
  0xc0   : > { %s774_s26 = scalar_lea.hbm %s1129_s17, 1024  ;;  %s778_s8 = scalar_lea.hbm %s1180_s2, 2048 }
  0xc1   : > { %p775_p9 = scmp.ne.s32.totalorder %s1129_s17, %s774_s26  ;;  %p779_p12 = scmp.lt.s32.totalorder %s1129_s17, %s1180_s2 }
  0xc2   : > { %p780_p1 = scmp.lt.s32.totalorder %s778_s8, %s774_s26 }
  0xc3   : > { %p776_p0 = pnand %p775_p9, %p1197_p13 }
  0xc4   : > { %p781_p3 = por %p780_p1, %p779_p12 }
  0xc5   : > { %p777_p11 = pneg %p776_p0 }
  0xc7   : > { %p782_p6 = pnand %p781_p3, %p777_p11 }
  0xc9   : > { %785 = shalt.err (!%p782_p6)
}
  0xca   : > { %s842_s7 = smov 512   ;;  %s843_s29 = smov 1024  }
  0xcb   : > { %s844_s14 = smov 32  }
  0xcc   : > { %637 = dma.vmem_to_hbm [thread:$0]  (%p1197_p13), %s1131_s28, 1024, %s1129_s17, %s485_s13, %s842_s7, %s843_s29, %s844_s14  }
  0xcd PF: > { %s513_s20 = sand.u32 1, %s816_s9   ;;  %p1198_p7 = scmp.ne.s32.totalorder %s1186_s22, 0 }
  0xce   : > { %p1199_p8 = scmp.ge.s32.totalorder %s828_s12, 2  ;;  %s514_s4 = scalar_lea.sflag [#allocation4], %s513_s20 }
  0xd0   : > { %p647_p10 = pnand %p1199_p8, %p1198_p7 }
  0xd2   : > { %p648_p2 = pneg %p647_p10 }
  0xd4   : > { %811 = dma.done.wait (%p648_p2), %s514_s4, 1024  }
  0xd5   : > { %813 = vsyncadd (%p648_p2), %s514_s4, 4294966272  ;;  %p18_p4 = scmp.ge.s32.totalorder %s885_s15, 4   ;;  %s1200_s9 = smov %s820_s10 }
  0xd6   : > { %s1201_s10 = smov %s824_s11  ;;  %s1202_s11 = smov %s897_s18 }
  0xd7   : > { %s1203_s12 = smov %s885_s15  ;;  %20 = sbr.rel (!%p18_p4) target bundleno = 7 (0x7), region = 88 }
  0xdc   :  { %519 = vsyncpa [#allocation3], 1 }
  0xdd   :  { %521 = vsyncpa [#allocation3 + $0x1], 1 }
  0xde   :  { %522 = vsyncpa [#allocation6], 1 }
  0xdf   :  { %524 = vsyncpa [#allocation6 + $0x1], 1 }
  0xe0   :  { %525 = vsyncpa [#allocation4], 1 }
  0xe1   :  { %527 = vsyncpa [#allocation4 + $0x1], 1 }

</bundles_post_ra>
